<compile_context>
chip_gen: v5e
topology: v5e:2x2
jax: 0.10.0
libtpu: 0.0.40
codegen_flags: <defaults>
</compile_context>

<pallas_src>
import jax
import jax.numpy as jnp
from jax.experimental import pallas as pl
from jax.experimental.pallas import tpu as pltpu


def _ca_state_copy_kernel(state_hbm, out_hbm, sem):
    # Abstract forward: no update rule is defined -> state passes through
    # unchanged.  One HBM->HBM DMA; nothing is staged through VMEM.
    cp = pltpu.make_async_copy(state_hbm, out_hbm, sem)
    cp.start()
    cp.wait()


@jax.jit
def ca_state_passthrough(state_grid: jax.Array) -> jax.Array:
    """Pallas pass-through of the CA state grid via a single HBM->HBM DMA."""
    return pl.pallas_call(
        _ca_state_copy_kernel,
        out_shape=jax.ShapeDtypeStruct(state_grid.shape, state_grid.dtype),
        in_specs=[pl.BlockSpec(memory_space=pl.ANY)],
        out_specs=pl.BlockSpec(memory_space=pl.ANY),
        scratch_shapes=[pltpu.SemaphoreType.DMA],
    )(state_grid)


class AbstractCAModelPallas:
    """JAX/Pallas mirror of the abstract PyTorch AbstractCAModel."""

    def __init__(self):
        # No parameters are defined in the PyTorch __init__.
        self.state_grid = None
        self.target = None

    def get_input(self, state_grid, target):
        self.state_grid = state_grid
        self.target = target

    def forward(self):
        # The reference raises NotImplementedError; this class stays abstract.
        raise NotImplementedError

    def optimize_parameters(self):
        raise NotImplementedError


if __name__ == "__main__":
    key = jax.random.PRNGKey(0)
    k1, k2 = jax.random.split(key)

    # Small CA-style shapes: batch=2, channels=4, spatial=16x16 (NCHW).
    state_grid = jax.random.normal(k1, (2, 4, 16, 16), dtype=jnp.float32)
    target = jax.random.normal(k2, (2, 4, 16, 16), dtype=jnp.float32)

    model = AbstractCAModelPallas()
    model.get_input(state_grid, target)

    # Verify the abstract-forward contract is preserved.
    try:
        model.forward()
        raise RuntimeError("forward() should be abstract")
    except NotImplementedError:
        pass

    # Run the Pallas kernel on the stored state (DMA pass-through).
    out = ca_state_passthrough(model.state_grid)
    out = jax.block_until_ready(out)

    assert out.shape == state_grid.shape
    assert out.dtype == state_grid.dtype
    assert bool(jnp.allclose(out, state_grid))

    print("KERNEL_OK")
</pallas_src>

<mosaic_0001>
module attributes {stable_mosaic.version = 11 : i64} {
  func.func @_ca_state_copy_kernel(%arg0: memref<2x4x16x16xf32, #tpu.memory_space<any>>, %arg1: memref<2x4x16x16xf32, #tpu.memory_space<any>>, %arg2: memref<!tpu.dma_semaphore, #tpu.memory_space<semaphore_mem>>) attributes {dimension_semantics = [], scalar_prefetch = 0 : i64, scratch_operands = 1 : i64, tpu.core_type = #tpu.core_type<tc>} {
    tpu.enqueue_dma source(%arg0 : memref<2x4x16x16xf32, #tpu.memory_space<any>>) target(%arg1 : memref<2x4x16x16xf32, #tpu.memory_space<any>>) target_semaphore(%arg2 : memref<!tpu.dma_semaphore, #tpu.memory_space<semaphore_mem>>)
    tpu.wait_dma2 semaphore(%arg2 : memref<!tpu.dma_semaphore, #tpu.memory_space<semaphore_mem>>) src(%arg0 : memref<2x4x16x16xf32, #tpu.memory_space<any>>) dst(%arg1 : memref<2x4x16x16xf32, #tpu.memory_space<any>>)
    return
  }
}

</mosaic_0001>

<bundles_post_ra>
// kernel: ca_state_passthrough.1
= control target key start
LH: loop header
LB: loop body
LE: loop exit
PB: predicated region body
PF: predicated region fallthrough
CT: control target
= control target key end

     0   :  { %s34_s12 = smov [#allocation2]   ;;  %s35_s13 = smov [#allocation3]   ;;  %s53_s0 = inlined_call_operand.hbm [shape: f32[2,4,16,16], index: 0, kind: input, shape index: {}]   ;;  %s54_s1 = inlined_call_operand.hbm [shape: f32[2,4,16,16], index: 1, kind: output, shape index: {}]  }
   0x1   :  { %s10_s8 = sshll.u32 %s53_s0, 4  ;;  %s12_s11 = sshll.u32 %s54_s1, 4  ;;  %s11_s8 = int_to_ptr.hbm [resolvable:$true] %s10_s8  ;;  %s13_s11 = int_to_ptr.hbm [resolvable:$true] %s12_s11 }
   0x2   :  { %s36_s14 = smov 0  }
   0x3   :  { %16 = dma.general %s11_s8, 2048, %s13_s11, %s34_s12, %s35_s13, [#allocation4], %s36_s14, 0  }
   0x4   :  { %32 = dma.done.wait [#allocation2], 2048 }
   0x5   :  { %33 = vsyncadd [#allocation2], 4294965248 }
   0x6   :  { %22 = vsyncmov [#allocation2] }
   0x9   :  { %s23_s15 = vpop.sfrf %22 }
   0xa   :  { %p28_p0 = scmp.ne.s32.totalorder %s23_s15, 0 }
   0xc   :  { %27 = shalt.err (%p28_p0)  }

</bundles_post_ra>
